<compile_context>
chip_gen: v5e
topology: v5e:2x2
jax: 0.10.0
libtpu: 0.0.40
codegen_flags: <defaults>
</compile_context>

<pallas_src>
import functools

import jax
import jax.numpy as jnp
from jax.experimental import pallas as pl
from jax.experimental.pallas import tpu as pltpu


def _round_up(x, m):
    return ((x + m - 1) // m) * m


# ----------------------------------------------------------------------------
# Kernel 1: projection.  Wh = h @ W (bf16 MXU), f1 column, f2 lane-dense row.
# ----------------------------------------------------------------------------
def _proj_kernel(h_ref, w_ref, a_ref, whb_ref, f1_ref, f2_ref):
    h = h_ref[...]                                # (TM, F_in)  bf16
    W = w_ref[...]                                # (F_in, Fp)  bf16
    a2 = a_ref[...]                               # (2, Fp)     f32, zero-padded

    # bf16 MXU operands, f32 accumulation.
    Wh = jnp.dot(h, W, preferred_element_type=jnp.float32)       # (TM, Fp) f32

    # f1[i] = Wh_i . a[:F_out]  -- VPU mul + lane reduce, stays sublane-major.
    f1 = jnp.sum(Wh * a2[0:1, :], axis=1, keepdims=True)         # (TM, 1)

    # f2 as a lane-dense row directly: (1, Fp) @ (Fp, TM) on the MXU, so no
    # relayout/transpose is needed between the two pallas_calls.
    f2row = jnp.dot(a2[1:2, :], Wh.T,
                    preferred_element_type=jnp.float32)          # (1, TM)

    whb_ref[...] = Wh.astype(whb_ref.dtype)       # bf16 copy for the MXU pass
    f1_ref[...] = f1
    f2_ref[...] = f2row


# ----------------------------------------------------------------------------
# Kernel 2: row-tiled attention.  One grid step handles TM query rows.
# ----------------------------------------------------------------------------
def _attn_kernel(adj_ref, f1_ref, f2_ref, wh_ref, out_ref, *, alpha, concat):
    f1 = f1_ref[...]                              # (TM, 1)  f32, this row tile
    f2 = f2_ref[...]                              # (1, Np)  f32, resident row
    adj = adj_ref[...]                            # (TM, Np) edge mask (any dtype)

    # Attention logits via rank-1 broadcast; LeakyReLU as max (alpha < 1).
    e = f1 + f2                                   # (TM, Np)
    e = jnp.maximum(e, alpha * e)

    # Mask non-edges with a scalar constant (no (TM,Np) constant temporary).
    att = jnp.where(adj > 0, e, -9e15)

    # Row-wise softmax; reciprocal rides the otherwise-idle EUP slot.
    att_max = jnp.max(att, axis=1, keepdims=True)
    att_exp = jnp.exp(att - att_max)
    denom = jnp.sum(att_exp, axis=1, keepdims=True)
    att = att_exp * pl.reciprocal(denom, approx=True)

    # TODO(synk): dropout on attention weights omitted (eval-mode identity).

    # h' = attention @ Wh, bf16 MXU operands with f32 accumulation.
    h_prime = jnp.dot(att.astype(wh_ref.dtype), wh_ref[...],
                      preferred_element_type=jnp.float32)        # (TM, Fp)

    if concat:
        # ELU; exp(min(x,0)) keeps the discarded branch finite.
        h_prime = jnp.where(h_prime > 0, h_prime,
                            jnp.exp(jnp.minimum(h_prime, 0.0)) - 1.0)

    out_ref[...] = h_prime.astype(out_ref.dtype)


# ----------------------------------------------------------------------------
# Wrapper.
# ----------------------------------------------------------------------------
def gat_layer(h, W, a, adj, *, alpha=0.2, concat=True):
    N, F_in = h.shape
    F_out = W.shape[1]
    LANE = 128

    # Row tile + padded node count.  Padded adj columns are zero -> masked ->
    # ~0 attention weight; padded rows are sliced off.
    # Note: when Np // TM == 1 only one TensorCore is used on v7x.
    if N <= 128:
        TM = _round_up(N, 8)
        Np = TM
    else:
        TM = 128          # sweep 256-512 on v6e for very large N; cap on v7x
        Np = _round_up(N, 128)
    Fp = _round_up(F_out, LANE)   # lane-dense feature axis for stores + MXU

    pad_n = Np - N
    if pad_n:
        h = jnp.pad(h, ((0, pad_n), (0, 0)))
        adj = jnp.pad(adj, ((0, pad_n), (0, pad_n)))

    pad_f = Fp - F_out
    a2 = a.reshape(2, F_out).astype(jnp.float32)
    if pad_f:
        W = jnp.pad(W, ((0, 0), (0, pad_f)))
        a2 = jnp.pad(a2, ((0, 0), (0, pad_f)))

    # bf16 operands for the projection MXU pass (halves h/W VMEM traffic too).
    h_b = h.astype(jnp.bfloat16)
    W_b = W.astype(jnp.bfloat16)

    n_tiles = Np // TM
    vmem_limit = 48 * 1024 * 1024   # headroom under v7x's 64 MiB physical VMEM

    # --- projection pass (row-tiled, parallel) ---
    whb, f1, f2row = pl.pallas_call(
        _proj_kernel,
        out_shape=(
            jax.ShapeDtypeStruct((Np, Fp), jnp.bfloat16),
            jax.ShapeDtypeStruct((Np, 1), jnp.float32),
            jax.ShapeDtypeStruct((1, Np), jnp.float32),
        ),
        grid=(n_tiles,),
        in_specs=[
            pl.BlockSpec((TM, F_in), lambda i: (i, 0)),
            pl.BlockSpec((F_in, Fp), lambda i: (0, 0)),
            pl.BlockSpec((2, Fp), lambda i: (0, 0)),
        ],
        out_specs=(
            pl.BlockSpec((TM, Fp), lambda i: (i, 0)),
            pl.BlockSpec((TM, 1), lambda i: (i, 0)),
            pl.BlockSpec((1, TM), lambda i: (0, i)),
        ),
        compiler_params=pltpu.CompilerParams(
            dimension_semantics=("parallel",),
            vmem_limit_bytes=vmem_limit),
    )(h_b, W_b, a2)

    # --- row-tiled attention pass ---
    kernel = functools.partial(_attn_kernel, alpha=alpha, concat=concat)
    adj_bytes = jnp.dtype(adj.dtype).itemsize
    cost = pl.CostEstimate(
        flops=2 * Np * Np * Fp + 6 * Np * Np,
        transcendentals=Np * Np,
        bytes_accessed=(Np * Np * adj_bytes + Np * Fp * 2 + 2 * Np * 4
                        + Np * Fp * 4),
    )
    out = pl.pallas_call(
        kernel,
        out_shape=jax.ShapeDtypeStruct((Np, Fp), jnp.float32),
        grid=(n_tiles,),
        in_specs=[
            pl.BlockSpec((TM, Np), lambda i: (i, 0)),      # adj row tile
            pl.BlockSpec((TM, 1), lambda i: (i, 0)),       # f1 column tile
            pl.BlockSpec((1, Np), lambda i: (0, 0)),       # f2 row (resident)
            pl.BlockSpec((Np, Fp), lambda i: (0, 0)),      # Wh bf16 (resident)
        ],
        out_specs=pl.BlockSpec((TM, Fp), lambda i: (i, 0)),
        compiler_params=pltpu.CompilerParams(
            dimension_semantics=("parallel",),
            vmem_limit_bytes=vmem_limit),
        cost_estimate=cost,
    )(adj, f1, f2row, whb)

    return out[:N, :F_out]


def xavier_uniform(key, shape, gain=1.414):
    fan_in, fan_out = shape[0], shape[1]
    limit = gain * (6.0 / (fan_in + fan_out)) ** 0.5
    return jax.random.uniform(key, shape, jnp.float32, minval=-limit, maxval=limit)


if __name__ == "__main__":
    # Small deterministic problem that still exercises >1 row tile:
    # N=256 nodes, in_features=16, out_features=8.
    N, F_in, F_out = 256, 16, 8
    alpha = 0.2

    key = jax.random.PRNGKey(0)
    k_h, k_w, k_a, k_adj = jax.random.split(key, 4)

    h = jax.random.normal(k_h, (N, F_in), dtype=jnp.float32)
    W = xavier_uniform(k_w, (F_in, F_out), gain=1.414)
    a = xavier_uniform(k_a, (2 * F_out, 1), gain=1.414)
    # Random sparse-ish adjacency with self loops.
    adj = (jax.random.uniform(k_adj, (N, N)) > 0.5).astype(jnp.float32)
    adj = jnp.maximum(adj, jnp.eye(N, dtype=jnp.float32))

    out = gat_layer(h, W, a, adj, alpha=alpha, concat=True)
    out = jax.block_until_ready(out)

    # Sanity check against a plain-JAX f32 reference of the same math
    # (tolerance accounts for the bf16 MXU operands in both matmuls).
    Wh = h @ W
    e = jax.nn.leaky_relu((Wh @ a[:F_out]) + (Wh @ a[F_out:]).T,
                          negative_slope=alpha)
    att = jax.nn.softmax(jnp.where(adj > 0, e, -9e15), axis=1)
    ref = jax.nn.elu(att @ Wh)
    assert out.shape == ref.shape
    assert jnp.allclose(out, ref, atol=5e-2, rtol=5e-2), "mismatch vs reference"

    print("KERNEL_OK")
</pallas_src>

<mosaic_0001>
module attributes {stable_mosaic.version = 11 : i64} {
  func.func @_proj_kernel(%arg0: i32, %arg1: memref<128x16xbf16, #tpu.memory_space<vmem>>, %arg2: memref<16x128xbf16, #tpu.memory_space<vmem>>, %arg3: memref<2x128xf32, #tpu.memory_space<vmem>>, %arg4: memref<128x128xbf16, #tpu.memory_space<vmem>>, %arg5: memref<128x1xf32, #tpu.memory_space<vmem>>, %arg6: memref<1x128xf32, #tpu.memory_space<vmem>>) attributes {dimension_semantics = [#tpu.dimension_semantics<parallel>], iteration_bounds = array<i64: 2>, scalar_prefetch = 0 : i64, scratch_operands = 0 : i64, tpu.core_type = #tpu.core_type<tc>, window_params = [{transform_indices = @transform_0, window_bounds = array<i64: 128, 16>}, {pipeline_mode = #tpu.pipeline_mode<synchronous>, transform_indices = @transform_1, window_bounds = array<i64: 16, 128>}, {pipeline_mode = #tpu.pipeline_mode<synchronous>, transform_indices = @transform_2, window_bounds = array<i64: 2, 128>}, {transform_indices = @transform_3, window_bounds = array<i64: 128, 128>}, {transform_indices = @transform_4, window_bounds = array<i64: 128, 1>}, {transform_indices = @transform_5, window_bounds = array<i64: 1, 128>}]} {
    %c0 = arith.constant 0 : index
    %c0_0 = arith.constant 0 : index
    %0 = vector.load %arg1[%c0, %c0_0] : memref<128x16xbf16, #tpu.memory_space<vmem>>, vector<128x16xbf16>
    %c0_1 = arith.constant 0 : index
    %c0_2 = arith.constant 0 : index
    %1 = vector.load %arg2[%c0_1, %c0_2] : memref<16x128xbf16, #tpu.memory_space<vmem>>, vector<16x128xbf16>
    %c0_3 = arith.constant 0 : index
    %c0_4 = arith.constant 0 : index
    %2 = vector.load %arg3[%c0_3, %c0_4] : memref<2x128xf32, #tpu.memory_space<vmem>>, vector<2x128xf32>
    %cst = arith.constant dense<0.000000e+00> : vector<128x128xf32>
    %3 = tpu.matmul %0, %1, %cst {dimension_numbers = #tpu.dot_dimension_numbers<[1], [0], [0], [1], [0, 0, 1, 1], [], []>} : vector<128x16xbf16>, vector<16x128xbf16>, vector<128x128xf32> -> vector<128x128xf32>
    %4 = vector.extract_strided_slice %2 {offsets = [0, 0], sizes = [1, 128], strides = [1, 1]} : vector<2x128xf32> to vector<1x128xf32>
    %5 = vector.broadcast %4 : vector<1x128xf32> to vector<128x128xf32>
    %6 = arith.mulf %3, %5 : vector<128x128xf32>
    %cst_5 = arith.constant dense<0.000000e+00> : vector<128xf32>
    %7 = vector.multi_reduction <add>, %6, %cst_5 [1] : vector<128x128xf32> to vector<128xf32>
    %8 = vector.shape_cast %7 : vector<128xf32> to vector<128x1xf32>
    %9 = vector.extract_strided_slice %2 {offsets = [1, 0], sizes = [1, 128], strides = [1, 1]} : vector<2x128xf32> to vector<1x128xf32>
    %10 = tpu.transpose %3, [1, 0] : vector<128x128xf32> -> vector<128x128xf32>
    %cst_6 = arith.constant dense<0.000000e+00> : vector<1x128xf32>
    %11 = tpu.matmul %9, %10, %cst_6 {dimension_numbers = #tpu.dot_dimension_numbers<[1], [0], [0], [1], [0, 0, 1, 1], [], []>} : vector<1x128xf32>, vector<128x128xf32>, vector<1x128xf32> -> vector<1x128xf32>
    %12 = arith.truncf %3 : vector<128x128xf32> to vector<128x128xbf16>
    %c0_7 = arith.constant 0 : index
    %c0_8 = arith.constant 0 : index
    %13 = vector.load %arg4[%c0_7, %c0_8] : memref<128x128xbf16, #tpu.memory_space<vmem>>, vector<128x128xbf16>
    tpu.vector_store %arg4[%c0_7, %c0_8], %12 {strides = array<i32>} : memref<128x128xbf16, #tpu.memory_space<vmem>>, vector<128x128xbf16>,
    %c0_9 = arith.constant 0 : index
    %c0_10 = arith.constant 0 : index
    %14 = vector.load %arg5[%c0_9, %c0_10] : memref<128x1xf32, #tpu.memory_space<vmem>>, vector<128x1xf32>
    tpu.vector_store %arg5[%c0_9, %c0_10], %8 {strides = array<i32>} : memref<128x1xf32, #tpu.memory_space<vmem>>, vector<128x1xf32>,
    %c0_11 = arith.constant 0 : index
    %c0_12 = arith.constant 0 : index
    %15 = vector.load %arg6[%c0_11, %c0_12] : memref<1x128xf32, #tpu.memory_space<vmem>>, vector<1x128xf32>
    tpu.vector_store %arg6[%c0_11, %c0_12], %11 {strides = array<i32>} : memref<1x128xf32, #tpu.memory_space<vmem>>, vector<1x128xf32>,
    return
  }
  func.func @transform_0(%arg0: i32) -> (i32, i32) {
    %c0_i32 = arith.constant 0 : i32
    %c0_i32_0 = arith.constant 0 : i32
    return %arg0, %c0_i32 : i32, i32
  }
  func.func @transform_1(%arg0: i32) -> (i32, i32) {
    %c0_i32 = arith.constant 0 : i32
    %c0_i32_0 = arith.constant 0 : i32
    %c0_i32_1 = arith.constant 0 : i32
    return %c0_i32, %c0_i32_0 : i32, i32
  }
  func.func @transform_2(%arg0: i32) -> (i32, i32) {
    %c0_i32 = arith.constant 0 : i32
    %c0_i32_0 = arith.constant 0 : i32
    %c0_i32_1 = arith.constant 0 : i32
    return %c0_i32, %c0_i32_0 : i32, i32
  }
  func.func @transform_3(%arg0: i32) -> (i32, i32) {
    %c0_i32 = arith.constant 0 : i32
    %c0_i32_0 = arith.constant 0 : i32
    return %arg0, %c0_i32 : i32, i32
  }
  func.func @transform_4(%arg0: i32) -> (i32, i32) {
    %c0_i32 = arith.constant 0 : i32
    %c0_i32_0 = arith.constant 0 : i32
    return %arg0, %c0_i32 : i32, i32
  }
  func.func @transform_5(%arg0: i32) -> (i32, i32) {
    %c0_i32 = arith.constant 0 : i32
    %c0_i32_0 = arith.constant 0 : i32
    return %c0_i32, %arg0 : i32, i32
  }
}

</mosaic_0001>

<bundles_post_ra>
// kernel: tpu_custom_call.1
= control target key start
LH: loop header
LB: loop body
LE: loop exit
PB: predicated region body
PF: predicated region fallthrough
CT: control target
= control target key end

     0   :  { %11 = vsyncpa [#allocation3], 0  ;;  %s1171_s0 = inlined_call_operand.vmem [shape: bf16[256,16], index: 0, kind: input, shape index: {}]   ;;  %s1172_s1 = inlined_call_operand.vmem [shape: bf16[16,128], index: 1, kind: input, shape index: {}]   ;;  %s1173_s2 = inlined_call_operand.vmem [shape: f32[2,128], index: 2, kind: input, shape index: {}]   ;;  %s1174_s3 = inlined_call_operand.hbm [shape: bf16[256,128], index: 3, kind: output, shape index: {0}]   ;;  %s1175_s4 = inlined_call_operand.vmem [shape: f32[256,1], index: 4, kind: output, shape index: {1}]   ;;  %s1176_s5 = inlined_call_operand.hbm [shape: f32[1,256], index: 5, kind: output, shape index: {2}]  }
   0x1   :  { %13 = vsyncpa [#allocation3 + $0x1], 0 }
   0x2   :  { %14 = vsyncpa [#allocation5], 0 }
   0x3   :  { %16 = vsyncpa [#allocation5 + $0x1], 0  ;;  %s959_s18 = smov 0   ;;  %s961_s19 = smov 0  }
   0x4   :  { %s963_s20 = smov 0   ;;  %s965_s21 = smov 0  }
   0x5 LB: > { %s980_s22 = sadd.s32 4294967295, %s925_s21   ;;  %s668_s23 = sadd.s32 4294967294, %s925_s21   ;;  %s925_s21 = sphi %s965_s21, %s1182_s21   ;;  %s921_s20 = sphi %s963_s20, %s1181_s20   ;;  %s917_s19 = sphi %s961_s19, %s1180_s19   ;;  %s913_s18 = sphi %s959_s18, %s1179_s18  }
   0x6   : > { %s984_s24 = sadd.s32 1, %s925_s21   ;;  %s97_s25 = sadd.s32 1, %s921_s20 }
   0x7   : > { %s94_s26 = ssub.s32 %s925_s21, %s984_s24  ;;  %p107_p0 = scmp.ne.s32.totalorder %s921_s20, %s917_s19 }
   0x8   : > { %p95_p1 = scmp.eq.s32.totalorder %s94_s26, 0  ;;  %p108_p2 = scmp.eq.s32.totalorder %s980_s22, 1 }
   0x9   : > { %p113_p3 = scmp.ne.s32.totalorder %s917_s19, %s913_s18  ;;  %p114_p4 = scmp.eq.s32.totalorder %s668_s23, 1 }
   0xa   : > { %s995_s27 = scalar_select %p95_p1, %s921_s20, %s97_s25  }
   0xb   : > { %p997_p5 = por %p108_p2, %p107_p0  ;;  %p1001_p6 = por %p114_p4, %p113_p3 }
   0xc   : > { %p671_p7 = scmp.ge.s32.totalorder %s925_s21, 1  ;;  %p199_p8 = scmp.lt.s32.totalorder %s925_s21, 3 }
   0xe   : > { %p200_p9 = pnand %p671_p7, %p199_p8 }
   0xf   : > { %s673_s7 = sshll.u32 (!%p200_p9), %s980_s22, 4  ;;  %s1038_s14 = sand.u32 (!%p200_p9), 1, %s917_s19  }
  0x10   : > { %203 = sbr.rel (%p200_p9) target bundleno = 406 (0x196), region = 32  ;;  %p237_p10 = scmp.lt.s32.totalorder (!%p200_p9), %s673_s7, 31 }
  0x11   : > { %s672_s15 = sshll.u32 (!%p200_p9), %s1038_s14, 6  ;;  %s735_s30 = sshll.u32 (!%p200_p9), %s980_s22, 6 }
  0x12   : > { %s1053_s16 = scalar_lea.vmem (!%p200_p9), [#allocation2], %s672_s15 }
  0x13   : > { %s533_s9 = sshll.u32 (!%p200_p9), %s1053_s16, 4  ;;  %s534_s9 = int_to_ptr.vmem [resolvable:$true] %s533_s9 }
  0x15   : > { %v734_v0 = vld [vmem:[%s1172_s1] sm:$0xff]  ;;  %s1184_s7 = smov (!%p237_p10, %s673_s7), 31  ;;  %vm315_vm0 = vcmask 130048   ;;  %vm493_vm1 = vcmask 7168  }
  0x16   : > { %347 = vmatpush.bf16.msra.mxu0 %v734_v0  ;;  %783 = vmatpush.bf16.msra.mxu2 %v734_v0  ;;  %s674_s8 = sshll.u32 %s1184_s7, 2  ;;  %v1028_v9 = vld [vmem:[%s1173_s2] sm:$0x3]  ;;  %s676_s17 = sshll.u32 %s1184_s7, 3 }
  0x17   : > { %784 = vmatpush.bf16.msra.mxu3 %v734_v0  ;;  %s240_s11 = scalar_lea.vmem %s1171_s0, %s674_s8  ;;  %v1031_v10 = vperm.slane %v1028_v9, 0  ;;  %s1085_s26 = scalar_lea.vmem %s1175_s4, %s676_s17  ;;  %v439_v52 = vrot.slane %v1028_v9, 1 }
  0x18   : > { %v726_v1 = vld [vmem:[%s240_s11] sm:$0xff]  ;;  %v729_v2 = vld [vmem:[%s240_s11 + $0x18] sm:$0xff]  ;;  %v727_v4 = vld [vmem:[%s240_s11 + $0x8] sm:$0xff]  ;;  %s532_s8 = scalar_lea.hbm %s1174_s3, %s735_s30  ;;  %s851_s17 = scalar_lea.hbm %s1174_s3, 128 }
  0x19   : > { %v730_v3 = vld [vmem:[%s240_s11 + $0x20] sm:$0xff]  ;;  %713 = vmatmul.msk.bf16.vlgmr.msra.gmra.mxu0 %vm315_vm0, %v726_v1  ;;  %716 = vmatmul.msk.bf16.vlgmr.msra.gmra.mxu2 %vm315_vm0, %v729_v2  ;;  %v731_v5 = vld [vmem:[%s240_s11 + $0x28] sm:$0xff]  ;;  %v728_v6 = vld [vmem:[%s240_s11 + $0x10] sm:$0xff]  ;;  %s535_s10 = sshll.u32 %s532_s8, 4  ;;  %s536_s10 = int_to_ptr.hbm [resolvable:$true] %s535_s10 }
  0x1a   : > { %717 = vmatmul.msk.bf16.vlgmr.msra.gmra.mxu3 %vm315_vm0, %v730_v3  ;;  %v732_v7 = vld [vmem:[%s240_s11 + $0x30] sm:$0xff]  ;;  %v733_v8 = vld [vmem:[%s240_s11 + $0x38] sm:$0xff]  ;;  %s512_s11 = scalar_lea.sflag [#allocation3], %s1038_s14  ;;  %s845_s12 = sshra.s32 %s536_s10, 4  ;;  %s846_s12 = int_to_ptr.hbm [resolvable:$true] %s845_s12 }
  0x1b   : > { %s847_s13 = scalar_lea.hbm %s846_s12, 64  ;;  %p852_p0 = scmp.lt.s32.totalorder %s846_s12, %s1174_s3 }
  0x1c   : > { %p848_p11 = scmp.ne.s32.totalorder %s846_s12, %s847_s13  ;;  %p853_p1 = scmp.lt.s32.totalorder %s851_s17, %s847_s13 }
  0x1e   : > { %p849_p12 = pnand %p848_p11, %p997_p5  ;;  %p854_p2 = por %p853_p1, %p852_p0 }
  0x20   : > { %p850_p13 = pneg %p849_p12 }
  0x22   : > { %p855_p3 = pnand %p854_p2, %p850_p13 }
  0x29   : > { %714 = vmatmul.msk.bf16.gmra.mxu0 %vm315_vm0, %v727_v4 }
  0x2a   : > { %718 = vmatmul.msk.bf16.gmra.mxu3 %vm315_vm0, %v731_v5 }
  0x39   : > { %715 = vmatmul.msk.bf16.gmra.mxu0 %vm315_vm0, %v728_v6 }
  0x3a   : > { %719 = vmatmul.msk.bf16.gmra.mxu3 %vm315_vm0, %v732_v7 }
  0x4a   : > { %720 = vmatmul.msk.bf16.gmra.mxu3 %vm315_vm0, %v733_v8 }
  0x96   : > { %v1033_v11 = vpop.f32.mrf.mxu0 }
  0x97   : > { %v390_v12 = vmul.f32 %v1031_v10, %v1033_v11 }
  0x99   : > { %406 = vadd.xlane.f32.xlu0 %v390_v12 }
  0x9c   : > { %v1040_v13 = vpop.f32.mrf.mxu2 }
  0x9d   : > { %v1042_v14 = vpop.f32.mrf.mxu3  ;;  %v396_v15 = vmul.f32 %v1031_v10, %v1040_v13 }
  0x9e   : > { %v398_v16 = vmul.f32 %v1031_v10, %v1042_v14  ;;  %v1049_v17 = vpop.f32.mrf.mxu0 }
  0x9f   : > { %v739_v18 = vpack.c.bf16 %v1049_v17, %v1033_v11  ;;  %v391_v23 = vmul.f32 %v1031_v10, %v1049_v17 }
  0xa0   : > { %422 = vadd.xlane.f32.xlu2 %v398_v16 }
  0xa1   : > { %418 = vadd.xlane.f32.xlu0 %v396_v15  ;;  %740 = vst [vmem:[%s1053_s16] sm:$0xff] %v739_v18  }
  0xa4   : > { %v366_v19 = vpop.f32.mrf.mxu2 }
  0xa5   : > { %v754_v20 = vpack.c.bf16 %v366_v19, %v1040_v13  ;;  %v371_v21 = vpop.f32.mrf.mxu3  ;;  %v397_v22 = vmul.f32 %v1031_v10, %v366_v19 }
  0xa6   : > { %v759_v24 = vpack.c.bf16 %v371_v21, %v1042_v14  ;;  %v354_v25 = vpop.f32.mrf.mxu0  ;;  %v399_v29 = vmul.f32 %v1031_v10, %v371_v21 }
  0xa7   : > { %778 = vst [vmem:[%s1053_s16 + $0x18] sm:$0xff] %v754_v20   ;;  %420 = vadd.xlane.f32.xlu1 %v397_v22  ;;  %v392_v26 = vmul.f32 %v1031_v10, %v354_v25 }
  0xa8   : > { %779 = vst [vmem:[%s1053_s16 + $0x20] sm:$0xff] %v759_v24  }
  0xa9   : > { %408 = vadd.xlane.f32.xlu0 %v391_v23 }
  0xad   : > { %v374_v27 = vpop.f32.mrf.mxu3 }
  0xae   : > { %v356_v28 = vpop.f32.mrf.mxu0  ;;  %v400_v32 = vmul.f32 %v1031_v10, %v374_v27 }
  0xaf   : > { %410 = vadd.xlane.f32.xlu1 %v392_v26  ;;  %v744_v30 = vpack.c.bf16 %v356_v28, %v354_v25  ;;  %v393_v36 = vmul.f32 %v1031_v10, %v356_v28 }
  0xb1   : > { %424 = vadd.xlane.f32.xlu0 %v399_v29  ;;  %776 = vst [vmem:[%s1053_s16 + $0x8] sm:$0xff] %v744_v30  }
  0xb5   : > { %v376_v31 = vpop.f32.mrf.mxu3 }
  0xb6   : > { %v764_v33 = vpack.c.bf16 %v376_v31, %v374_v27  ;;  %v401_v34 = vmul.f32 %v1031_v10, %v376_v31  ;;  %v359_v35 = vpop.f32.mrf.mxu0 }
  0xb7   : > { %426 = vadd.xlane.f32.xlu1 %v400_v32  ;;  %v394_v37 = vmul.f32 %v1031_v10, %v359_v35 }
  0xb8   : > { %780 = vst [vmem:[%s1053_s16 + $0x28] sm:$0xff] %v764_v33   ;;  %428 = vadd.xlane.f32.xlu2 %v401_v34 }
  0xbd   : > { %v379_v38 = vpop.f32.mrf.mxu3 }
  0xbe   : > { %v402_v39 = vmul.f32 %v1031_v10, %v379_v38  ;;  %v361_v40 = vpop.f32.mrf.mxu0 }
  0xbf   : > { %412 = vadd.xlane.f32.xlu1 %v393_v36  ;;  %v749_v41 = vpack.c.bf16 %v361_v40, %v359_v35  ;;  %v395_v42 = vmul.f32 %v1031_v10, %v361_v40 }
  0xc0   : > { %430 = vadd.xlane.f32.xlu0 %v402_v39  ;;  %414 = vadd.xlane.f32.xlu2 %v394_v37 }
  0xc1   : > { %777 = vst [vmem:[%s1053_s16 + $0x10] sm:$0xff] %v749_v41  }
  0xc5   : > { %v381_v43 = vpop.f32.mrf.mxu3 }
  0xc6   : > { %v769_v44 = vpack.c.bf16 %v381_v43, %v379_v38  ;;  %v403_v45 = vmul.f32 %v1031_v10, %v381_v43 }
  0xc8   : > { %781 = vst [vmem:[%s1053_s16 + $0x30] sm:$0xff] %v769_v44   ;;  %432 = vadd.xlane.f32.xlu1 %v403_v45  ;;  %416 = vadd.xlane.f32.xlu2 %v395_v42 }
  0xcd   : > { %v384_v46 = vpop.f32.mrf.mxu3 }
  0xce   : > { %v404_v47 = vmul.f32 %v1031_v10, %v384_v46 }
  0xd0   : > { %434 = vadd.xlane.f32.xlu2 %v404_v47 }
  0xd5   : > { %v386_v48 = vpop.f32.mrf.mxu3 }
  0xd6   : > { %v774_v49 = vpack.c.bf16 %v386_v48, %v384_v46  ;;  %441 = vmatpush.xpose.msra.mxu1 %v386_v48  ;;  %v405_v50 = vmul.f32 %v1031_v10, %v386_v48 }
  0xd8   : > { %782 = vst [vmem:[%s1053_s16 + $0x38] sm:$0xff] %v774_v49   ;;  %436 = vadd.xlane.f32.xlu0 %v405_v50 }
  0xda   : > { %442 = vmatpush.xpose.msra.mxu1 %v384_v46 }
  0xde   : > { %443 = vmatpush.xpose.msra.mxu1 %v381_v43 }
  0xe2   : > { %444 = vmatpush.xpose.msra.mxu1 %v379_v38 }
  0xe6   : > { %445 = vmatpush.xpose.msra.mxu1 %v376_v31 }
  0xea   : > { %446 = vmatpush.xpose.msra.mxu1 %v374_v27 }
  0xee   : > { %447 = vmatpush.xpose.msra.mxu1 %v371_v21 }
  0xf2   : > { %448 = vmatpush.xpose.msra.mxu1 %v1042_v14 }
  0xf6   : > { %449 = vmatpush.xpose.msra.mxu1 %v366_v19 }
  0xfa   : > { %450 = vmatpush.xpose.msra.mxu1 %v1040_v13 }
  0xfe   : > { %451 = vmatpush.xpose.msra.mxu1 %v361_v40 }
 0x102   : > { %452 = vmatpush.xpose.msra.mxu1 %v359_v35 }
 0x106   : > { %453 = vmatpush.xpose.msra.mxu1 %v356_v28 }
 0x10a   : > { %454 = vmatpush.xpose.msra.mxu1 %v354_v25 }
 0x10c   : > { %v407_v51 = vpop.xlane.xlu0 %406 }
 0x10d   : > { %494 = vst.msk [vmem:[%s1085_s26] sm:$0xff] %vm493_vm1, %v407_v51 }
 0x10e   : > { %455 = vmatpush.xpose.msra.mxu1 %v1049_v17 }
 0x112   : > { %456 = vmatpush.xpose.msra.mxu1 %v1033_v11 }
 0x113   : > { %v423_v53 = vpop.xlane.xlu2 %422 }
 0x114   : > { %502 = vst.msk [vmem:[%s1085_s26 + $0x40] sm:$0xff] %vm493_vm1, %v423_v53  ;;  %v419_v54 = vpop.xlane.xlu0 %418 }
 0x115   : > { %500 = vst.msk [vmem:[%s1085_s26 + $0x30] sm:$0xff] %vm493_vm1, %v419_v54  ;;  %457 = vmatmul.f32.vlgmr.msra.gmra.mxu1 %v439_v52 }
 0x116   : > { %858 = shalt.err (!%p855_p3)
}
 0x117   : > { %s927_s30 = smov 64   ;;  %s928_s6 = smov 4  }
 0x118   : > { %785 = dma.vmem_to_hbm [thread:$0]  (%p997_p5), %s534_s9, 1024, %s536_s10, %s512_s11, %s927_s30, %s927_s30, %s928_s6  }
 0x119   : > { %s551_s9 = scalar_lea.hbm %s1176_s5, %s980_s22  ;;  %s235_s10 = scalar_lea.vmem [#allocation4], %s1038_s14 }
 0x11a   : > { %v421_v55 = vpop.xlane.xlu1 %420  ;;  %s553_s11 = sshll.u32 %s235_s10, 4  ;;  %s555_s12 = sshll.u32 %s551_s9, 4  ;;  %s554_s11 = int_to_ptr.vmem [resolvable:$true] %s553_s11  ;;  %s556_s12 = int_to_ptr.hbm [resolvable:$true] %s555_s12 }
 0x11b   : > { %501 = vst.msk [vmem:[%s1085_s26 + $0x38] sm:$0xff] %vm493_vm1, %v421_v55  ;;  %s522_s13 = scalar_lea.sflag [#allocation5], %s1038_s14  ;;  %s873_s15 = sshra.s32 %s556_s12, 4  ;;  %s874_s15 = int_to_ptr.hbm [resolvable:$true] %s873_s15 }
 0x11c   : > { %v409_v56 = vpop.xlane.xlu0 %408  ;;  %s875_s16 = scalar_lea.hbm %s874_s15, 1  ;;  %s879_s23 = scalar_lea.hbm %s1176_s5, 2 }
 0x11d   : > { %495 = vst.msk [vmem:[%s1085_s26 + $0x8] sm:$0xff] %vm493_vm1, %v409_v56  ;;  %p876_p4 = scmp.ne.s32.totalorder %s874_s15, %s875_s16  ;;  %p880_p9 = scmp.lt.s32.totalorder %s874_s15, %s1176_s5 }
 0x11e   : > { %p881_p10 = scmp.lt.s32.totalorder %s879_s23, %s875_s16 }
 0x11f   : > { %p877_p7 = pnand %p876_p4, %p997_p5 }
 0x120   : > { %p882_p11 = por %p881_p10, %p880_p9 }
 0x121   : > { %p878_p8 = pneg %p877_p7 }
 0x122   : > { %v411_v57 = vpop.xlane.xlu1 %410 }
 0x123   : > { %496 = vst.msk [vmem:[%s1085_s26 + $0x10] sm:$0xff] %vm493_vm1, %v411_v57  ;;  %p883_p12 = pnand %p882_p11, %p878_p8 }
 0x124   : > { %v425_v58 = vpop.xlane.xlu0 %424 }
 0x125   : > { %503 = vst.msk [vmem:[%s1085_s26 + $0x48] sm:$0xff] %vm493_vm1, %v425_v58 }
 0x12a   : > { %v427_v59 = vpop.xlane.xlu1 %426 }
 0x12b   : > { %v429_v60 = vpop.xlane.xlu2 %428  ;;  %504 = vst.msk [vmem:[%s1085_s26 + $0x50] sm:$0xff] %vm493_vm1, %v427_v59 }
 0x12c   : > { %505 = vst.msk [vmem:[%s1085_s26 + $0x58] sm:$0xff] %vm493_vm1, %v429_v60 }
 0x132   : > { %v413_v61 = vpop.xlane.xlu1 %412 }
 0x133   : > { %v431_v62 = vpop.xlane.xlu0 %430  ;;  %497 = vst.msk [vmem:[%s1085_s26 + $0x18] sm:$0xff] %vm493_vm1, %v413_v61  ;;  %v415_v63 = vpop.xlane.xlu2 %414 }
 0x134   : > { %506 = vst.msk [vmem:[%s1085_s26 + $0x60] sm:$0xff] %vm493_vm1, %v431_v62 }
 0x135   : > { %498 = vst.msk [vmem:[%s1085_s26 + $0x20] sm:$0xff] %vm493_vm1, %v415_v63 }
 0x13b   : > { %v433_v0 = vpop.xlane.xlu1 %432  ;;  %v417_v1 = vpop.xlane.xlu2 %416 }
 0x13c   : > { %507 = vst.msk [vmem:[%s1085_s26 + $0x68] sm:$0xff] %vm493_vm1, %v433_v0 }
 0x13d   : > { %499 = vst.msk [vmem:[%s1085_s26 + $0x28] sm:$0xff] %vm493_vm1, %v417_v1 }
 0x143   : > { %v435_v2 = vpop.xlane.xlu2 %434 }
 0x144   : > { %508 = vst.msk [vmem:[%s1085_s26 + $0x70] sm:$0xff] %vm493_vm1, %v435_v2 }
 0x14b   : > { %v437_v3 = vpop.xlane.xlu0 %436 }
 0x14c   : > { %509 = vst.msk [vmem:[%s1085_s26 + $0x78] sm:$0xff] %vm493_vm1, %v437_v3 }
 0x192   : > { %v458_v4 = vpop.f32.mrf.mxu1 }
 0x193   : > { %510 = vst [vmem:[%s235_s10] sm:$0x1] %v458_v4 }
 0x194   : > { %886 = shalt.err (!%p883_p12)
}
 0x195   : > { %786 = dma.vmem_to_hbm [thread:$0]  (%p997_p5), %s554_s11, 16, %s556_s12, %s522_s13  }
 0x196 PF: > { %p796_p13 = scmp.ge.s32.totalorder %s925_s21, 2  ;;  %s567_s14 = sand.u32 1, %s913_s18  }
 0x197   : > { %s568_s30 = scalar_lea.sflag [#allocation3], %s567_s14 }
 0x198   : > { %p790_p0 = pnand %p796_p13, %p1001_p6 }
 0x19a   : > { %p791_p1 = pneg %p790_p0 }
 0x19c   : > { %904 = dma.done.wait (%p791_p1), %s568_s30, 1024  }
 0x19d   : > { %906 = vsyncadd (%p791_p1), %s568_s30, 4294966272  ;;  %s586_s6 = scalar_lea.sflag [#allocation5], %s567_s14 }
 0x19e   : > { %908 = dma.done.wait (%p791_p1), %s586_s6, 16  }
 0x19f   : > { %910 = vsyncadd (%p791_p1), %s586_s6, 4294967280  ;;  %p19_p5 = scmp.ge.s32.totalorder %s984_s24, 4   ;;  %s1179_s18 = smov %s917_s19 }
 0x1a0   : > { %s1180_s19 = smov %s921_s20  ;;  %s1181_s20 = smov %s995_s27 }
 0x1a1   : > { %s1182_s21 = smov %s984_s24  ;;  %21 = sbr.rel (!%p19_p5) target bundleno = 5 (0x5), region = 96 }
 0x1a6   :  { %591 = vsyncpa [#allocation3], 1 }
 0x1a7   :  { %593 = vsyncpa [#allocation3 + $0x1], 1 }
 0x1a8   :  { %594 = vsyncpa [#allocation5], 1 }
 0x1a9   :  { %596 = vsyncpa [#allocation5 + $0x1], 1 }

</bundles_post_ra>
